<compile_context>
chip_gen: v5e
topology: v5e:2x2
jax: 0.10.0
libtpu: 0.0.40
codegen_flags: <defaults>
</compile_context>

<pallas_src>
import functools

import jax
import jax.numpy as jnp
from jax import lax
from jax.experimental import pallas as pl
from jax.experimental.pallas import tpu as pltpu


# bf16 image blocks above this size are single-buffered (they only change at
# batch boundaries, so double-buffering just doubles the largest VMEM buffer).
_IMG_SINGLE_BUFFER_BYTES = 8 * 1024 * 1024


def _flowarp_kernel(base_ref, flo_ref, im_ref, out_ref, *, C, H, W):
    # base_ref: (2, TK) f32   rows = (x_base, y_base) for this pixel tile
    # flo_ref : (2, TK) f32   rows = (flo_x, flo_y)
    # im_ref  : (C*H, W) bf16 whole image for this batch element (VMEM resident)
    # out_ref : (C, TK) f32
    xb = base_ref[0:1, :]
    yb = base_ref[1:2, :]
    fx = flo_ref[0:1, :]
    fy = flo_ref[1:2, :]

    # Sample coordinates; border padding == clamp to the valid range.
    x = jnp.clip(xb + fx, 0.0, float(W - 1))                       # (1, TK)
    y = jnp.clip(yb + fy, 0.0, float(H - 1))                       # (1, TK)

    tk = x.shape[1]
    colf = lax.broadcasted_iota(jnp.int32, (W, tk), 0).astype(jnp.float32)
    rowf = lax.broadcasted_iota(jnp.int32, (H, tk), 0).astype(jnp.float32)

    # Bilinear "hat" weights: max(0, 1 - |i - coord|).  With coord clamped to
    # [0, dim-1] this reproduces border-padded bilinear weights exactly
    # (weights sum to 1, single weight of 1 at the clamped border).
    Xw = jnp.maximum(1.0 - jnp.abs(colf - x), 0.0).astype(jnp.bfloat16)  # (W, TK)
    Yw = jnp.maximum(1.0 - jnp.abs(rowf - y), 0.0)                       # (H, TK)

    # Stage 1: horizontal interpolation on the MXU (bf16 x bf16 -> f32 acc).
    #   (C*H, W) @ (W, TK) -> (C*H, TK)
    tmp = jnp.dot(im_ref[...], Xw, preferred_element_type=jnp.float32)

    # Stage 2: vertical interpolation — fused reshape + broadcast-multiply +
    # reduce over H (no per-channel concatenate / relayout).
    out = jnp.sum(tmp.reshape(C, H, tk) * Yw[None, :, :], axis=1)        # (C, TK)
    out_ref[...] = out.astype(out_ref.dtype)


def _vmem_capacity_bytes():
    try:
        return int(pltpu.get_tpu_info().vmem_capacity_bytes)
    except Exception:
        return 64 * 1024 * 1024            # conservative (v7x-sized) default


def _pick_tile(HW, C, H, W, budget_bytes, n_img_buf, min_tiles=1, cap=4096):
    """Largest lane-dense (multiple-of-128) pixel tile whose full VMEM
    footprint (pipeline buffers + stage intermediates + resident image) fits
    inside budget_bytes."""
    img_bytes = n_img_buf * C * H * W * 2                  # bf16 image buffers

    def fits(tk):
        per_tk = (2 * (2 * tk * 4)        # base coords, double-buffered
                  + 2 * (2 * tk * 4)      # flow, double-buffered
                  + 2 * (C * tk * 4)      # output tile, double-buffered
                  + C * H * tk * 4        # stage-1 product (f32)
                  + W * tk * 6            # Xw (f32 build + bf16 copy)
                  + H * tk * 4)           # Yw (f32)
        return img_bytes + per_tk <= budget_bytes

    if HW <= 128:
        return HW                          # full-extent block is always legal

    best_div = None
    best_any = None
    t = 128
    while t <= min(HW, cap):
        if fits(t) and pl.cdiv(HW, t) >= min_tiles:
            best_any = t
            if HW % t == 0:
                best_div = t
        t += 128
    if best_div is not None and (best_any is None or 2 * best_div >= best_any):
        return best_div                    # exact divisor: no masked partial tile
    if best_any is not None:
        return best_any                    # partial last tile (masked writes)
    return 128                             # minimum lane-dense tile


def _flowarp_impl(im, flo_x, flo_y):
    """im: (B, C, H, W), flo_x/flo_y: (B, H, W) -> (B, C, H, W) f32."""
    B, C, H, W = im.shape
    HW = H * W

    # Generation-aware VMEM budgeting.
    vmem_cap = _vmem_capacity_bytes()
    if vmem_cap <= 64 * 1024 * 1024:                       # v7x-class part
        vmem_limit = min(vmem_cap // 2, 32 * 1024 * 1024)
    else:                                                  # v5e / v6e (128 MiB)
        vmem_limit = min(int(vmem_cap * 0.75), 100 * 1024 * 1024)
    budget = int(vmem_limit * 0.8)

    img_block_bytes = C * H * W * 2                        # bf16 image block
    single_buf_img = img_block_bytes > _IMG_SINGLE_BUFFER_BYTES
    n_img_buf = 1 if single_buf_img else 2

    TK = _pick_tile(HW, C, H, W, budget, n_img_buf,
                    min_tiles=2 if B == 1 else 1)
    n_t = pl.cdiv(HW, TK)

    im_f = im.reshape(B, C * H, W).astype(jnp.bfloat16)
    flo = jnp.stack([flo_x, flo_y], axis=1).reshape(B, 2, HW).astype(jnp.float32)

    # Base meshgrid — equivalent of the module's registered x/y buffers.
    yy, xx = jnp.meshgrid(jnp.arange(H, dtype=jnp.float32),
                          jnp.arange(W, dtype=jnp.float32), indexing="ij")
    base = jnp.stack([xx.reshape(-1), yy.reshape(-1)], axis=0)       # (2, HW)

    kernel = functools.partial(_flowarp_kernel, C=C, H=H, W=W)

    # Full image per batch; constant along the tile axis so it is DMA'd once
    # per batch and stays resident in VMEM.  Single-buffer it when large.
    im_spec_kwargs = {}
    if single_buf_img:
        im_spec_kwargs["pipeline_mode"] = pl.Buffered(1)
    im_spec = pl.BlockSpec((pl.Squeezed(), C * H, W), lambda b, t: (b, 0, 0),
                           **im_spec_kwargs)

    out = pl.pallas_call(
        kernel,
        out_shape=jax.ShapeDtypeStruct((B, C, HW), jnp.float32),
        grid_spec=pltpu.PrefetchScalarGridSpec(
            num_scalar_prefetch=0,
            grid=(B, n_t),
            in_specs=[
                # base coords: shared across batch, tiled along pixels
                pl.BlockSpec((2, TK), lambda b, t: (0, t)),
                # merged flow: tiled along pixels
                pl.BlockSpec((pl.Squeezed(), 2, TK), lambda b, t: (b, 0, t)),
                im_spec,
            ],
            out_specs=pl.BlockSpec((pl.Squeezed(), C, TK),
                                   lambda b, t: (b, 0, t)),
        ),
        compiler_params=pltpu.CompilerParams(
            dimension_semantics=("parallel", "parallel"),
            vmem_limit_bytes=vmem_limit,
        ),
    )(base, flo, im_f)

    return out.reshape(B, C, H, W)


def flowarp(im, flo_x, flo_y):
    """im: (B, C, H, W), flo_x/flo_y: (B, H, W) -> warped (B, C, H, W) f32."""
    B, C, H, W = im.shape
    if H > W:
        # Contract over the larger spatial dim on the MXU: transpose so the
        # matmul K-dim is max(H, W); roles of the flow components swap too.
        out_t = _flowarp_impl(jnp.transpose(im, (0, 1, 3, 2)),
                              jnp.transpose(flo_y, (0, 2, 1)),
                              jnp.transpose(flo_x, (0, 2, 1)))
        return jnp.transpose(out_t, (0, 1, 3, 2))
    return _flowarp_impl(im, flo_x, flo_y)


def _flowarp_ref(im, flo_x, flo_y):
    """Pure-JAX reference (same semantics) for a sanity check."""
    B, C, H, W = im.shape
    xb = jnp.arange(W, dtype=jnp.float32)[None, None, :]      # (1,1,W)
    yb = jnp.arange(H, dtype=jnp.float32)[None, :, None]      # (1,H,1)
    x = jnp.clip(xb + flo_x, 0.0, W - 1.0)                    # (B,H,W)
    y = jnp.clip(yb + flo_y, 0.0, H - 1.0)
    x0 = jnp.floor(x); y0 = jnp.floor(y)
    wx = x - x0; wy = y - y0
    x0 = x0.astype(jnp.int32); y0 = y0.astype(jnp.int32)
    x1 = jnp.minimum(x0 + 1, W - 1); y1 = jnp.minimum(y0 + 1, H - 1)

    def gather(yi, xi):
        idx = yi * W + xi                                      # (B,H,W)
        imf = im.reshape(B, C, H * W)
        return jax.vmap(lambda a, i: a[:, i.reshape(-1)].reshape(C, H, W))(imf, idx)

    v00 = gather(y0, x0); v01 = gather(y0, x1)
    v10 = gather(y1, x0); v11 = gather(y1, x1)
    w00 = ((1 - wx) * (1 - wy))[:, None]; w01 = (wx * (1 - wy))[:, None]
    w10 = ((1 - wx) * wy)[:, None];       w11 = (wx * wy)[:, None]
    return v00 * w00 + v01 * w01 + v10 * w10 + v11 * w11


if __name__ == "__main__":
    key = jax.random.PRNGKey(0)
    k1, k2, k3, k4, k5, k6 = jax.random.split(key, 6)

    # Case 1: square image, B > 1.
    B, C, H, W = 2, 4, 16, 16
    im = jax.random.normal(k1, (B, C, H, W), dtype=jnp.float32)
    flo_x = 2.5 * jax.random.normal(k2, (B, H, W), dtype=jnp.float32)
    flo_y = 2.5 * jax.random.normal(k3, (B, H, W), dtype=jnp.float32)

    out = flowarp(im, flo_x, flo_y)
    jax.block_until_ready(out)
    # Reference uses the bf16-roundtripped image (the kernel deliberately
    # stores the image in bf16); remaining difference is bf16 weight rounding.
    ref = _flowarp_ref(im.astype(jnp.bfloat16).astype(jnp.float32), flo_x, flo_y)
    assert out.shape == (B, C, H, W)
    err = float(jnp.max(jnp.abs(out - ref)))
    assert err < 4e-2, f"case1 max err {err}"

    # Case 2: tall image (H > W) exercises the transposed / large-K path;
    # B == 1 exercises the ">= 2 pixel tiles" megacore split.
    B2, C2, H2, W2 = 1, 3, 32, 8
    im2 = jax.random.normal(k4, (B2, C2, H2, W2), dtype=jnp.float32)
    fx2 = 2.0 * jax.random.normal(k5, (B2, H2, W2), dtype=jnp.float32)
    fy2 = 2.0 * jax.random.normal(k6, (B2, H2, W2), dtype=jnp.float32)

    out2 = flowarp(im2, fx2, fy2)
    jax.block_until_ready(out2)
    ref2 = _flowarp_ref(im2.astype(jnp.bfloat16).astype(jnp.float32), fx2, fy2)
    assert out2.shape == (B2, C2, H2, W2)
    err2 = float(jnp.max(jnp.abs(out2 - ref2)))
    assert err2 < 4e-2, f"case2 max err {err2}"

    print("KERNEL_OK")
</pallas_src>

<mosaic_0001>
module attributes {stable_mosaic.version = 11 : i64} {
  func.func @_flowarp_kernel(%arg0: i32, %arg1: i32, %arg2: memref<2x256xf32, #tpu.memory_space<vmem>>, %arg3: memref<1x2x256xf32, #tpu.memory_space<vmem>>, %arg4: memref<1x64x16xbf16, #tpu.memory_space<vmem>>, %arg5: memref<1x4x256xf32, #tpu.memory_space<vmem>>) attributes {dimension_semantics = [#tpu.dimension_semantics<parallel>, #tpu.dimension_semantics<parallel>], iteration_bounds = array<i64: 2, 1>, scalar_prefetch = 0 : i64, scratch_operands = 0 : i64, tpu.core_type = #tpu.core_type<tc>, window_params = [{transform_indices = @transform_0, window_bounds = array<i64: 2, 256>}, {transform_indices = @transform_1, window_bounds = array<i64: 1, 2, 256>}, {transform_indices = @transform_2, window_bounds = array<i64: 1, 64, 16>}, {transform_indices = @transform_3, window_bounds = array<i64: 1, 4, 256>}]} {
    %c0 = arith.constant 0 : index
    %c0_0 = arith.constant 0 : index
    %0 = vector.load %arg2[%c0, %c0_0] : memref<2x256xf32, #tpu.memory_space<vmem>>, vector<1x256xf32>
    %c1 = arith.constant 1 : index
    %c0_1 = arith.constant 0 : index
    %1 = vector.load %arg2[%c1, %c0_1] : memref<2x256xf32, #tpu.memory_space<vmem>>, vector<1x256xf32>
    %c0_2 = arith.constant 0 : index
    %c0_3 = arith.constant 0 : index
    %c0_4 = arith.constant 0 : index
    %2 = vector.load %arg3[%c0_2, %c0_3, %c0_4] : memref<1x2x256xf32, #tpu.memory_space<vmem>>, vector<1x1x256xf32>
    %3 = vector.shape_cast %2 : vector<1x1x256xf32> to vector<1x256xf32>
    %c0_5 = arith.constant 0 : index
    %c1_6 = arith.constant 1 : index
    %c0_7 = arith.constant 0 : index
    %4 = vector.load %arg3[%c0_5, %c1_6, %c0_7] : memref<1x2x256xf32, #tpu.memory_space<vmem>>, vector<1x1x256xf32>
    %5 = vector.shape_cast %4 : vector<1x1x256xf32> to vector<1x256xf32>
    %6 = arith.addf %0, %3 : vector<1x256xf32>
    %cst = arith.constant 0.000000e+00 : f32
    %cst_8 = arith.constant 1.500000e+01 : f32
    %7 = vector.broadcast %cst : f32 to vector<1x256xf32>
    %8 = arith.maximumf %7, %6 : vector<1x256xf32>
    %9 = vector.broadcast %cst_8 : f32 to vector<1x256xf32>
    %10 = arith.minimumf %9, %8 : vector<1x256xf32>
    %11 = arith.addf %1, %5 : vector<1x256xf32>
    %cst_9 = arith.constant 0.000000e+00 : f32
    %cst_10 = arith.constant 1.500000e+01 : f32
    %12 = vector.broadcast %cst_9 : f32 to vector<1x256xf32>
    %13 = arith.maximumf %12, %11 : vector<1x256xf32>
    %14 = vector.broadcast %cst_10 : f32 to vector<1x256xf32>
    %15 = arith.minimumf %14, %13 : vector<1x256xf32>
    %16 = tpu.iota {dimensions = array<i32: 0>} : vector<16x256xi32>
    %17 = arith.sitofp %16 : vector<16x256xi32> to vector<16x256xf32>
    %18 = tpu.iota {dimensions = array<i32: 0>} : vector<16x256xi32>
    %19 = arith.sitofp %18 : vector<16x256xi32> to vector<16x256xf32>
    %20 = vector.broadcast %10 : vector<1x256xf32> to vector<16x256xf32>
    %21 = arith.subf %17, %20 : vector<16x256xf32>
    %22 = math.absf %21 : vector<16x256xf32>
    %cst_11 = arith.constant 1.000000e+00 : f32
    %23 = vector.broadcast %cst_11 : f32 to vector<16x256xf32>
    %24 = arith.subf %23, %22 : vector<16x256xf32>
    %cst_12 = arith.constant 0.000000e+00 : f32
    %25 = vector.broadcast %cst_12 : f32 to vector<16x256xf32>
    %26 = arith.maximumf %24, %25 : vector<16x256xf32>
    %27 = arith.truncf %26 : vector<16x256xf32> to vector<16x256xbf16>
    %28 = vector.broadcast %15 : vector<1x256xf32> to vector<16x256xf32>
    %29 = arith.subf %19, %28 : vector<16x256xf32>
    %30 = math.absf %29 : vector<16x256xf32>
    %cst_13 = arith.constant 1.000000e+00 : f32
    %31 = vector.broadcast %cst_13 : f32 to vector<16x256xf32>
    %32 = arith.subf %31, %30 : vector<16x256xf32>
    %cst_14 = arith.constant 0.000000e+00 : f32
    %33 = vector.broadcast %cst_14 : f32 to vector<16x256xf32>
    %34 = arith.maximumf %32, %33 : vector<16x256xf32>
    %c0_15 = arith.constant 0 : index
    %c0_16 = arith.constant 0 : index
    %c0_17 = arith.constant 0 : index
    %35 = vector.load %arg4[%c0_15, %c0_16, %c0_17] : memref<1x64x16xbf16, #tpu.memory_space<vmem>>, vector<1x64x16xbf16>
    %36 = vector.shape_cast %35 : vector<1x64x16xbf16> to vector<64x16xbf16>
    %cst_18 = arith.constant dense<0.000000e+00> : vector<64x256xf32>
    %37 = tpu.matmul %36, %27, %cst_18 {dimension_numbers = #tpu.dot_dimension_numbers<[1], [0], [0], [1], [0, 0, 1, 1], [], []>} : vector<64x16xbf16>, vector<16x256xbf16>, vector<64x256xf32> -> vector<64x256xf32>
    %38 = vector.shape_cast %37 : vector<64x256xf32> to vector<4x16x256xf32>
    %39 = vector.shape_cast %34 : vector<16x256xf32> to vector<1x16x256xf32>
    %40 = vector.broadcast %39 : vector<1x16x256xf32> to vector<4x16x256xf32>
    %41 = arith.mulf %38, %40 : vector<4x16x256xf32>
    %cst_19 = arith.constant dense<0.000000e+00> : vector<4x256xf32>
    %42 = vector.multi_reduction <add>, %41, %cst_19 [1] : vector<4x16x256xf32> to vector<4x256xf32>
    %c0_20 = arith.constant 0 : index
    %c0_21 = arith.constant 0 : index
    %c0_22 = arith.constant 0 : index
    %43 = vector.load %arg5[%c0_20, %c0_21, %c0_22] : memref<1x4x256xf32, #tpu.memory_space<vmem>>, vector<1x4x256xf32>
    %44 = vector.shape_cast %43 : vector<1x4x256xf32> to vector<4x256xf32>
    %45 = vector.shape_cast %42 : vector<4x256xf32> to vector<1x4x256xf32>
    tpu.vector_store %arg5[%c0_20, %c0_21, %c0_22], %45 {strides = array<i32>} : memref<1x4x256xf32, #tpu.memory_space<vmem>>, vector<1x4x256xf32>,
    return
  }
  func.func @transform_0(%arg0: i32, %arg1: i32) -> (i32, i32) {
    %c0_i32 = arith.constant 0 : i32
    %c0_i32_0 = arith.constant 0 : i32
    return %c0_i32, %arg1 : i32, i32
  }
  func.func @transform_1(%arg0: i32, %arg1: i32) -> (i32, i32, i32) {
    %c0_i32 = arith.constant 0 : i32
    %c0_i32_0 = arith.constant 0 : i32
    return %arg0, %c0_i32, %arg1 : i32, i32, i32
  }
  func.func @transform_2(%arg0: i32, %arg1: i32) -> (i32, i32, i32) {
    %c0_i32 = arith.constant 0 : i32
    %c0_i32_0 = arith.constant 0 : i32
    %c0_i32_1 = arith.constant 0 : i32
    return %arg0, %c0_i32, %c0_i32_0 : i32, i32, i32
  }
  func.func @transform_3(%arg0: i32, %arg1: i32) -> (i32, i32, i32) {
    %c0_i32 = arith.constant 0 : i32
    %c0_i32_0 = arith.constant 0 : i32
    return %arg0, %c0_i32, %arg1 : i32, i32, i32
  }
}

</mosaic_0001>

<bundles_post_ra>
// kernel: tpu_custom_call.1
= control target key start
LH: loop header
LB: loop body
LE: loop exit
PB: predicated region body
PF: predicated region fallthrough
CT: control target
= control target key end

     0   :  { %8 = vsyncpa [#allocation3], 0  ;;  %s958_s0 = inlined_call_operand.vmem [shape: f32[2,256], index: 0, kind: input, shape index: {}]   ;;  %s959_s1 = inlined_call_operand.vmem [shape: f32[2,2,256], index: 1, kind: input, shape index: {}]   ;;  %s960_s2 = inlined_call_operand.vmem [shape: bf16[2,64,16], index: 2, kind: input, shape index: {}]   ;;  %s961_s3 = inlined_call_operand.hbm [shape: f32[2,4,256], index: 3, kind: output, shape index: {}]  }
   0x1   :  { %10 = vsyncpa [#allocation3 + $0x1], 0  ;;  %s837_s12 = smov 0   ;;  %s839_s13 = smov 0  }
   0x2   :  { %s841_s14 = smov 0   ;;  %s843_s15 = smov 0  }
   0x3   :  { %s845_s16 = smov 0   ;;  %s847_s17 = smov 0  }
   0x4 LB: > { %s631_s18 = sadd.s32 4294967295, %s815_s17   ;;  %s632_s19 = sadd.s32 4294967294, %s815_s17   ;;  %s815_s17 = sphi %s847_s17, %s16_s17   ;;  %s811_s16 = sphi %s845_s16, %s968_s16   ;;  %s807_s15 = sphi %s843_s15, %s967_s15   ;;  %s803_s14 = sphi %s841_s14, %s966_s14   ;;  %s799_s13 = sphi %s839_s13, %s965_s13   ;;  %s795_s12 = sphi %s837_s12, %s964_s12  }
   0x5   : > { %s28_s20 = sadd.s32 1, %s811_s16  ;;  %s117_s21 = sadd.s32 1, %s803_s14 }
   0x6   : > { %p30_p0 = scmp.ge.s32.totalorder %s28_s20, 2  ;;  %p127_p1 = scmp.ne.s32.totalorder %s803_s14, %s799_s13 }
   0x7   : > { %p128_p2 = scmp.eq.s32.totalorder %s631_s18, 1  ;;  %p133_p3 = scmp.ne.s32.totalorder %s799_s13, %s795_s12 }
   0x8   : > { %s970_s20 = smov (%p30_p0, %s28_s20), 0  ;;  %p134_p5 = scmp.eq.s32.totalorder %s632_s19, 1 }
   0x9   : > { %p877_p4 = por %p128_p2, %p127_p1  ;;  %s112_s23 = ssub.s32 %s811_s16, %s970_s20 }
   0xa   : > { %p636_p6 = scmp.ge.s32.totalorder %s815_s17, 1  ;;  %p115_p7 = scmp.eq.s32.totalorder %s112_s23, 0 }
   0xb   : > { %p884_p8 = por %p134_p5, %p133_p3  ;;  %p182_p9 = scmp.lt.s32.totalorder %s815_s17, 3 }
   0xc   : > { %s890_s25 = scalar_select %p115_p7, %s803_s14, %s117_s21  }
   0xd   : > { %p183_p10 = pnand %p636_p6, %p182_p9 }
   0xe   : > { %p227_p11 = scmp.lt.s32.totalorder (!%p183_p10), %s807_s15, 1  ;;  %s217_s18 = sand.u32 (!%p183_p10), 1, %s799_s13  }
   0xf   : > { %186 = sbr.rel (%p183_p10) target bundleno = 229 (0xe5), region = 32  ;;  %s913_s19 = sshll.u32 (!%p183_p10), %s217_s18, 3 }
  0x10   : > { %s679_s21 = sshll.u32 (!%p183_p10), %s807_s15, 3  ;;  %s510_s30 = scalar_lea.sflag (!%p183_p10), [#allocation3], %s217_s18 }
  0x11   : > { %s757_s8 = scalar_lea.hbm (!%p183_p10), %s961_s3, 16 }
  0x14   : > { %v255_v0 = vlaneseq  ;;  %s228_s26 = scalar_select %p227_p11, %s807_s15, 1  ;;  %v243_v2 = vld [vmem:[%s958_s0] ss:$2 sm:$0x3]  ;;  %vm332_vm0 = vcmask 130048   ;;  %vm487_vm1 = vcmask 1043456  }
  0x15   : > { %v642_v34 = vld [vmem:[%s958_s0 + $0x1] ss:$2 sm:$0x3]  ;;  %vm493_vm2 = vcmask 1041409   ;;  %vm495_vm3 = vcmask 1045509   ;;  %vm498_vm4 = vcmask 1042434  }
  0x16   : > { %v256_v1 = vshrl.u32 %v255_v0, 7  ;;  %s673_s27 = sshll.u32 %s228_s26, 2  ;;  %s674_s6 = sshll.u32 %s228_s26, 5  ;;  %vm500_vm5 = vcmask 1046534   ;;  %vm503_vm6 = vcmask 1043459   ;;  %vm505_vm7 = vcmask 1047559  }
  0x17   : > { %s900_s5 = scalar_lea.vmem %s959_s1, %s673_s27  ;;  %s240_s9 = scalar_lea.vmem %s960_s2, %s674_s6 }
  0x18   : > { %v246_v3 = vld [vmem:[%s900_s5] ss:$2 sm:$0x3]  ;;  %v257_v5 = vadd.s32 8, %v256_v1  ;;  %v258_v8 = vcvt.s32.f32 %v256_v1  ;;  %v677_v31 = vld [vmem:[%s240_s9 + $0x10] sm:$0xff]  ;;  %v676_v32 = vld [vmem:[%s240_s9 + $0x8] sm:$0xff]  ;;  %s523_s27 = scalar_lea.hbm %s961_s3, %s679_s21 }
  0x19   : > { %v249_v4 = vadd.f32 %v246_v3, %v243_v2  ;;  %v675_v30 = vld [vmem:[%s240_s9] sm:$0xff]  ;;  %v678_v33 = vld [vmem:[%s240_s9 + $0x18] sm:$0xff]  ;;  %s219_s15 = scalar_lea.vmem [#allocation2], %s913_s19  ;;  %s527_s29 = sshll.u32 %s523_s27, 4  ;;  %s528_s29 = int_to_ptr.hbm [resolvable:$true] %s527_s29 }
  0x1a   : > { %v259_v9 = vcvt.s32.f32 %v257_v5  ;;  %v643_v35 = vld [vmem:[%s900_s5 + $0x1] ss:$2 sm:$0x3]  ;;  %s525_s28 = sshll.u32 %s219_s15, 4  ;;  %s751_s4 = sshra.s32 %s528_s29, 4  ;;  %s526_s28 = int_to_ptr.vmem [resolvable:$true] %s525_s28  ;;  %s752_s4 = int_to_ptr.hbm [resolvable:$true] %s751_s4 }
  0x1b   : > { %v250_v6 = vmax.f32 %v249_v4, 0.0  ;;  %v252_v36 = vadd.f32 %v643_v35, %v642_v34  ;;  %s753_s5 = scalar_lea.hbm %s752_s4, 8  ;;  %p758_p1 = scmp.lt.s32.totalorder %s752_s4, %s961_s3 }
  0x1c   : > { %p754_p12 = scmp.ne.s32.totalorder %s752_s4, %s753_s5  ;;  %p759_p2 = scmp.lt.s32.totalorder %s757_s8, %s753_s5 }
  0x1d   : > { %v251_v7 = vmin.f32 %v250_v6, 15.0  ;;  %v253_v37 = vmax.f32 %v252_v36, 0.0 }
  0x1e   : > { %p755_p13 = pnand %p754_p12, %p877_p4  ;;  %p760_p3 = por %p759_p2, %p758_p1 }
  0x1f   : > { %v261_v10 = vperm.slane %v251_v7, 0  ;;  %v262_v11 = vperm.slane %v251_v7, 1  ;;  %v254_v38 = vmin.f32 %v253_v37, 15.0 }
  0x20   : > { %p756_p0 = pneg %p755_p13 }
  0x21   : > { %v265_v12 = vsub.f32 %v258_v8, %v261_v10  ;;  %v267_v13 = vsub.f32 %v259_v9, %v261_v10  ;;  %v266_v14 = vsub.f32 %v258_v8, %v262_v11  ;;  %v268_v15 = vsub.f32 %v259_v9, %v262_v11 }
  0x22   : > { %v285_v39 = vperm.slane %v254_v38, 1  ;;  %v284_v42 = vperm.slane %v254_v38, 0  ;;  %p761_p5 = pnand %p760_p3, %p756_p0 }
  0x23   : > { %v269_v16 = vand.u32 2147483647, %v265_v12  ;;  %v271_v17 = vand.u32 2147483647, %v267_v13  ;;  %v270_v18 = vand.u32 2147483647, %v266_v14 }
  0x24   : > { %v272_v19 = vand.u32 2147483647, %v268_v15  ;;  %v291_v40 = vsub.f32 %v259_v9, %v285_v39  ;;  %v289_v41 = vsub.f32 %v258_v8, %v285_v39  ;;  %v290_v45 = vsub.f32 %v259_v9, %v284_v42 }
  0x25   : > { %v273_v20 = vsub.f32 1.0, %v269_v16  ;;  %v275_v21 = vsub.f32 1.0, %v271_v17  ;;  %v274_v22 = vsub.f32 1.0, %v270_v18  ;;  %v288_v47 = vsub.f32 %v258_v8, %v284_v42 }
  0x26   : > { %v276_v23 = vsub.f32 1.0, %v272_v19  ;;  %v295_v43 = vand.u32 2147483647, %v291_v40  ;;  %v293_v44 = vand.u32 2147483647, %v289_v41 }
  0x27   : > { %v277_v24 = vmax.f32 %v273_v20, 0.0  ;;  %v279_v25 = vmax.f32 %v275_v21, 0.0  ;;  %v278_v26 = vmax.f32 %v274_v22, 0.0  ;;  %v294_v51 = vand.u32 2147483647, %v290_v45 }
  0x28   : > { %v280_v27 = vmax.f32 %v276_v23, 0.0  ;;  %v299_v49 = vsub.f32 1.0, %v295_v43  ;;  %v297_v50 = vsub.f32 1.0, %v293_v44  ;;  %v292_v52 = vand.u32 2147483647, %v288_v47 }
  0x29   : > { %v281_v28 = vpack.c.bf16 %v279_v25, %v277_v24  ;;  %v298_v57 = vsub.f32 1.0, %v294_v51 }
  0x2a   : > { %v282_v29 = vpack.c.bf16 %v280_v27, %v278_v26  ;;  %v303_v54 = vmax.f32 %v299_v49, 0.0  ;;  %v301_v55 = vmax.f32 %v297_v50, 0.0  ;;  %v296_v59 = vsub.f32 1.0, %v292_v52 }
  0x2b   : > { %352 = vmatpush.bf16.msra.mxu0 %v281_v28  ;;  %680 = vmatpush.bf16.msra.mxu2 %v281_v28  ;;  %v302_v63 = vmax.f32 %v298_v57, 0.0 }
  0x2c   : > { %381 = vmatpush.bf16.msra.mxu1 %v282_v29  ;;  %681 = vmatpush.bf16.msra.mxu3 %v282_v29  ;;  %v300_v0 = vmax.f32 %v296_v59, 0.0 }
  0x2e   : > { %660 = vmatmul.msk.bf16.vlgmr.msra.gmra.mxu0 %vm332_vm0, %v675_v30  ;;  %662 = vmatmul.msk.bf16.vlgmr.msra.gmra.mxu2 %vm332_vm0, %v677_v31 }
  0x2f   : > { %664 = vmatmul.msk.bf16.vlgmr.msra.gmra.mxu1 %vm332_vm0, %v675_v30  ;;  %666 = vmatmul.msk.bf16.vlgmr.msra.gmra.mxu3 %vm332_vm0, %v677_v31 }
  0x3e   : > { %661 = vmatmul.msk.bf16.gmra.mxu0 %vm332_vm0, %v676_v32  ;;  %663 = vmatmul.msk.bf16.gmra.mxu2 %vm332_vm0, %v678_v33 }
  0x3f   : > { %665 = vmatmul.msk.bf16.gmra.mxu1 %vm332_vm0, %v676_v32  ;;  %667 = vmatmul.msk.bf16.gmra.mxu3 %vm332_vm0, %v678_v33 }
  0xab   : > { %v354_v46 = vpop.f32.mrf.mxu0 }
  0xac   : > { %v383_v48 = vpop.f32.mrf.mxu1  ;;  %v403_v10 = vmul.f32 %v354_v46, %v300_v0 }
  0xad   : > { %v404_v62 = vmul.f32 %v383_v48, %v301_v55 }
  0xb1   : > { %v364_v53 = vpop.f32.mrf.mxu2 }
  0xb2   : > { %v393_v56 = vpop.f32.mrf.mxu3  ;;  %v411_v6 = vmul.f32 %v364_v53, %v300_v0 }
  0xb3   : > { %v356_v58 = vpop.f32.mrf.mxu0  ;;  %v412_v7 = vmul.f32 %v393_v56, %v301_v55 }
  0xb4   : > { %v385_v60 = vpop.f32.mrf.mxu1  ;;  %v405_v3 = vmul.f32 %v356_v58, %v302_v63 }
  0xb5   : > { %v406_v61 = vmul.f32 %v385_v60, %v303_v54 }
  0xb6   : > { %v419_v15 = vadd.f32 %v405_v3, %v403_v10 }
  0xb7   : > { %v426_v1 = vadd.f32 %v406_v61, %v404_v62 }
  0xb8   : > { %v420_v21 = vrot.slane %v419_v15, 4 }
  0xb9   : > { %v366_v2 = vpop.f32.mrf.mxu2  ;;  %v427_v11 = vrot.slane %v426_v1, 4 }
  0xba   : > { %v413_v4 = vmul.f32 %v366_v2, %v302_v63  ;;  %v395_v5 = vpop.f32.mrf.mxu3  ;;  %v421_v32 = vadd.f32 %v420_v21, %v419_v15 }
  0xbb   : > { %v414_v8 = vmul.f32 %v395_v5, %v303_v54  ;;  %v359_v9 = vpop.f32.mrf.mxu0  ;;  %v428_v17 = vadd.f32 %v427_v11, %v426_v1 }
  0xbc   : > { %v388_v12 = vpop.f32.mrf.mxu1  ;;  %v447_v13 = vadd.f32 %v413_v4, %v411_v6  ;;  %v407_v26 = vmul.f32 %v359_v9, %v300_v0  ;;  %v422_v41 = vrot.slane %v421_v32, 2 }
  0xbd   : > { %v454_v14 = vadd.f32 %v414_v8, %v412_v7  ;;  %v429_v25 = vrot.slane %v428_v17, 2  ;;  %v408_v30 = vmul.f32 %v388_v12, %v301_v55 }
  0xbe   : > { %v448_v18 = vrot.slane %v447_v13, 4  ;;  %v423_v58 = vadd.f32 %v422_v41, %v421_v32 }
  0xbf   : > { %v455_v16 = vrot.slane %v454_v14, 4  ;;  %v430_v36 = vadd.f32 %v429_v25, %v428_v17 }
  0xc0   : > { %v449_v29 = vadd.f32 %v448_v18, %v447_v13 }
  0xc1   : > { %v456_v19 = vadd.f32 %v455_v16, %v454_v14  ;;  %v369_v20 = vpop.f32.mrf.mxu2  ;;  %v431_v50 = vrot.slane %v430_v36, 1 }
  0xc2   : > { %v398_v22 = vpop.f32.mrf.mxu3  ;;  %v450_v38 = vrot.slane %v449_v29, 2  ;;  %v415_v42 = vmul.f32 %v369_v20, %v300_v0 }
  0xc3   : > { %v457_v23 = vrot.slane %v456_v19, 2  ;;  %v361_v24 = vpop.f32.mrf.mxu0  ;;  %v416_v47 = vmul.f32 %v398_v22, %v301_v55  ;;  %v432_v1 = vadd.f32 %v431_v50, %v430_v36 }
  0xc4   : > { %v409_v27 = vmul.f32 %v361_v24, %v302_v63  ;;  %v390_v28 = vpop.f32.mrf.mxu1  ;;  %v451_v53 = vadd.f32 %v450_v38, %v449_v29 }
  0xc5   : > { %v410_v31 = vmul.f32 %v390_v28, %v303_v54  ;;  %v458_v34 = vadd.f32 %v457_v23, %v456_v19  ;;  %v483_v9 = vrot.slane %v432_v1, 4 }
  0xc6   : > { %v433_v33 = vadd.f32 %v409_v27, %v407_v26  ;;  %v452_v2 = vrot.slane %v451_v53, 1 }
  0xc7   : > { %v440_v35 = vadd.f32 %v410_v31, %v408_v30  ;;  %v459_v46 = vrot.slane %v458_v34, 1 }
  0xc8   : > { %v434_v37 = vrot.slane %v433_v33, 4  ;;  %v453_v11 = vadd.f32 %v452_v2, %v451_v53 }
  0xc9   : > { %v441_v39 = vrot.slane %v440_v35, 4  ;;  %v371_v40 = vpop.f32.mrf.mxu2  ;;  %v460_v61 = vadd.f32 %v459_v46, %v458_v34 }
  0xca   : > { %v435_v43 = vadd.f32 %v434_v37, %v433_v33  ;;  %v417_v44 = vmul.f32 %v371_v40, %v302_v63  ;;  %v400_v45 = vpop.f32.mrf.mxu3 }
  0xcb   : > { %v442_v48 = vadd.f32 %v441_v39, %v440_v35  ;;  %v418_v49 = vmul.f32 %v400_v45, %v303_v54  ;;  %v424_v54 = vrot.slane %v423_v58, 1  ;;  %v485_v6 = vrot.slane %v460_v61, 4 }
  0xcc   : > { %v436_v51 = vrot.slane %v435_v43, 2  ;;  %v461_v52 = vadd.f32 %v417_v44, %v415_v42 }
  0xcd   : > { %v443_v56 = vrot.slane %v442_v48, 2  ;;  %v468_v57 = vadd.f32 %v418_v49, %v416_v47  ;;  %v425_v15 = vadd.f32 %v424_v54, %v423_v58  ;;  %v490_v19 = vsel %vm487_vm1, %v453_v11, %v485_v6 }
  0xce   : > { %v437_v59 = vadd.f32 %v436_v51, %v435_v43  ;;  %v462_v60 = vrot.slane %v461_v52, 4  ;;  %v497_v24 = vrot.slane %v490_v19, 6 }
  0xcf   : > { %v444_v62 = vadd.f32 %v443_v56, %v442_v48  ;;  %v469_v0 = vrot.slane %v468_v57, 4  ;;  %v488_v22 = vsel %vm487_vm1, %v425_v15, %v483_v9 }
  0xd0   : > { %v463_v63 = vadd.f32 %v462_v60, %v461_v52  ;;  %v438_v3 = vrot.slane %v437_v59, 1 }
  0xd1   : > { %v445_v55 = vrot.slane %v444_v62, 1  ;;  %v470_v4 = vadd.f32 %v469_v0, %v468_v57 }
  0xd2   : > { %v464_v5 = vrot.slane %v463_v63, 2  ;;  %v439_v12 = vadd.f32 %v438_v3, %v437_v59 }
  0xd3   : > { %v446_v7 = vadd.f32 %v445_v55, %v444_v62  ;;  %v471_v8 = vrot.slane %v470_v4, 2 }
  0xd4   : > { %v465_v10 = vadd.f32 %v464_v5, %v463_v63 }
  0xd5   : > { %v484_v13 = vrot.slane %v446_v7, 4  ;;  %v472_v14 = vadd.f32 %v471_v8, %v470_v4 }
  0xd6   : > { %v466_v16 = vrot.slane %v465_v10, 1 }
  0xd7   : > { %v473_v17 = vrot.slane %v472_v14, 1  ;;  %v489_v18 = vsel %vm487_vm1, %v439_v12, %v484_v13 }
  0xd8   : > { %v492_v20 = vrot.slane %v489_v18, 7  ;;  %v467_v25 = vadd.f32 %v466_v16, %v465_v10 }
  0xd9   : > { %v474_v21 = vadd.f32 %v473_v17, %v472_v14 }
  0xda   : > { %v494_v23 = vsel %vm493_vm2, %v492_v20, %v488_v22 }
  0xdb   : > { %v486_v26 = vrot.slane %v474_v21, 4  ;;  %v496_v27 = vsel %vm495_vm3, %v492_v20, %v494_v23 }
  0xdc   : > { %v499_v28 = vsel %vm498_vm4, %v497_v24, %v496_v27 }
  0xdd   : > { %v491_v29 = vsel %vm487_vm1, %v467_v25, %v486_v26  ;;  %v501_v31 = vsel %vm500_vm5, %v497_v24, %v499_v28 }
  0xde   : > { %v502_v30 = vrot.slane %v491_v29, 5 }
  0xe0   : > { %v504_v32 = vsel %vm503_vm6, %v502_v30, %v501_v31 }
  0xe1   : > { %v506_v33 = vsel %vm505_vm7, %v502_v30, %v504_v32 }
  0xe2   : > { %508 = vst [vmem:[%s219_s15] sm:$0xff] %v506_v33 }
  0xe3   : > { %764 = shalt.err (!%p761_p5)
}
  0xe4   : > { %682 = dma.vmem_to_hbm [thread:$0]  (%p877_p4), %s526_s28, 128, %s528_s29, %s510_s30  }
  0xe5 PF: > { %p688_p6 = scmp.ge.s32.totalorder %s815_s17, 2  ;;  %s539_s11 = sand.u32 1, %s795_s12  }
  0xe6   : > { %s540_s18 = scalar_lea.sflag [#allocation3], %s539_s11 }
  0xe7   : > { %p685_p7 = pnand %p688_p6, %p884_p8 }
  0xe9   : > { %p686_p9 = pneg %p685_p7 }
  0xeb   : > { %790 = dma.done.wait (%p686_p9), %s540_s18, 128  }
  0xec   : > { %792 = vsyncadd (%p686_p9), %s540_s18, 4294967168  ;;  %s16_s17 = sadd.s32 1, %s815_s17   ;;  %s964_s12 = smov %s799_s13 }
  0xed   : > { %p13_p10 = scmp.ge.s32.totalorder %s16_s17, 4   ;;  %s965_s13 = smov %s803_s14 }
  0xee   : > { %s966_s14 = smov %s890_s25  ;;  %s967_s15 = smov %s811_s16 }
  0xef   : > { %s968_s16 = smov %s970_s20  ;;  %15 = sbr.rel (!%p13_p10) target bundleno = 4 (0x4), region = 75 }
  0xf4   :  { %546 = vsyncpa [#allocation3], 1 }
  0xf5   :  { %548 = vsyncpa [#allocation3 + $0x1], 1 }

</bundles_post_ra>
